<compile_context>
chip_gen: v7x
topology: tpu7x:2x2x1
jax: 0.10.0
libtpu: 0.0.40
codegen_flags: <defaults>
</compile_context>

<pallas_src>
import functools

import jax
import jax.numpy as jnp
from jax import lax
from jax.experimental import pallas as pl
from jax.experimental.pallas import tpu as pltpu


# ---------------------------------------------------------------------------
# Fused kernel: pointwise conv head  +  sigmoid / max / normalized soft-argmax
# ---------------------------------------------------------------------------
def _sppe_fused_kernel(stride, x_ref, w_ref, b_ref, coord_ref, out_ref):
    # x_ref    : (TB, Cin, HW)   batch tile, NCHW flattened (HW lane-dense)
    # w_ref    : (Cout, Cin)     pointwise-conv weight
    # b_ref    : (Cout, 1)       pointwise-conv bias
    # coord_ref: (2, HW)         row 0 = x coords, row 1 = y coords (row-major)
    # out_ref  : (TB, Cout, 3)   [x, y, confidence] per joint
    tb, cin, hw = x_ref.shape
    cout = w_ref.shape[0]

    x = x_ref[...].astype(jnp.float32)        # (TB, Cin, HW)
    w = w_ref[...].astype(jnp.float32)        # (Cout, Cin)
    b = b_ref[...].astype(jnp.float32)        # (Cout, 1)

    if min(cin, cout) >= 64:
        # Large contraction: worth the MXU.  (If this path is ever hot, orient
        # the operands as (HW, Cin) x (Cin, Cout) so the 128-multiple HW axis
        # feeds the systolic rows; unused at FastPose head sizes.)
        hm = jnp.einsum("oc,bch->boh", w, x,
                        preferred_element_type=jnp.float32)
        hm = hm + b.reshape(1, cout, 1)
    else:
        # Tiny K: unrolled VPU multiply-adds (MXU would use <8/256 rows and
        # still pay fill/drain latency).
        hm = jnp.broadcast_to(b.reshape(1, cout, 1), (tb, cout, hw))
        for k in range(cin):                  # static, fully unrolled
            hm = hm + w[:, k : k + 1].reshape(1, cout, 1) * x[:, k : k + 1, :]

    prob = jax.nn.sigmoid(hm)                                   # (TB, Cout, HW)

    # confidence = max over spatial positions of sigmoid(hm) (pre-normalization)
    conf = jnp.max(prob, axis=-1, keepdims=True)                # (TB, Cout, 1)
    total = jnp.sum(prob, axis=-1, keepdims=True)               # (TB, Cout, 1)

    coords = coord_ref[...].astype(jnp.float32)                 # (2, HW)
    cx = coords[0:1, :].reshape(1, 1, hw)
    cy = coords[1:2, :].reshape(1, 1, hw)

    # Normalization (prob / prob.sum) is linear -> fold into divide by total.
    inv_total = 1.0 / total
    hmx = jnp.sum(prob * cx, axis=-1, keepdims=True) * inv_total * stride
    hmy = jnp.sum(prob * cy, axis=-1, keepdims=True) * inv_total * stride

    # Single merged store per grid step: columns [x, y, conf].
    col = lax.broadcasted_iota(jnp.int32, (tb, cout, 3), 2)
    out_ref[...] = jnp.where(col == 0, hmx, jnp.where(col == 1, hmy, conf))


# ---------------------------------------------------------------------------
# MySPPE forward (synthetic SPPE head + exact keypoint decoding), fully fused
# ---------------------------------------------------------------------------
def my_sppe_forward(x, weight, bias, *, vmem_budget_bytes=24 << 20):
    """x: (B, Cin, H, W), weight: (Cout, Cin), bias: (Cout,) -> (B, Cout, 3)."""
    B, Cin, H, W = x.shape
    Cout = weight.shape[0]
    HW = H * W
    stride = float(int(256 / H))              # same formula as the PyTorch module

    x3 = x.reshape(B, Cin, HW)                # contiguous reshape, no transpose
    b2 = bias.reshape(Cout, 1)

    # Loop-invariant flattened spatial coordinates, computed once outside the
    # kernel and kept resident in VMEM (constant index_map).
    lin = jnp.arange(HW, dtype=jnp.int32)
    coords = jnp.stack(
        [(lin % W).astype(jnp.float32), (lin // W).astype(jnp.float32)], axis=0
    )                                          # (2, HW)

    # Batch tile TB: as many batch elements per grid step as the VMEM budget
    # allows (input double-buffered; hm/prob/conf live as f32 intermediates).
    per_b_bytes = 2 * Cin * HW * 4 + 3 * Cout * HW * 4
    tb = max(1, min(B, vmem_budget_bytes // max(per_b_bytes, 1)))
    while B % tb:                              # keep tiles uniform (B is small)
        tb -= 1
    nsteps = B // tb

    # Scoped-VMEM limit: derived from the tile, capped below v7x's 64 MiB.
    vmem_limit = int(min(max(2 * tb * per_b_bytes + (1 << 20), 16 << 20),
                         48 << 20))

    kern = functools.partial(_sppe_fused_kernel, stride)
    out = pl.pallas_call(
        kern,
        out_shape=jax.ShapeDtypeStruct((B, Cout, 3), jnp.float32),
        grid_spec=pltpu.PrefetchScalarGridSpec(
            num_scalar_prefetch=0,
            grid=(nsteps,),
            in_specs=[
                pl.BlockSpec((tb, Cin, HW), lambda i: (i, 0, 0)),
                pl.BlockSpec((Cout, Cin), lambda i: (0, 0)),
                pl.BlockSpec((Cout, 1), lambda i: (0, 0)),
                pl.BlockSpec((2, HW), lambda i: (0, 0)),
            ],
            out_specs=pl.BlockSpec((tb, Cout, 3), lambda i: (i, 0, 0)),
        ),
        compiler_params=pltpu.CompilerParams(
            # One collapsed step -> nothing to shard; only mark "parallel" when
            # there are multiple substantial batch tiles.
            dimension_semantics=("arbitrary",) if nsteps == 1 else ("parallel",),
            vmem_limit_bytes=vmem_limit,
        ),
    )(x3, weight, b2, coords)
    return out


if __name__ == "__main__":
    key = jax.random.PRNGKey(0)
    kx, kw, kb = jax.random.split(key, 3)

    B, Cin, H, W = 2, 4, 16, 16                # NCHW input, like the PyTorch module
    Cout = 8                                   # synthetic number of joints

    x = jax.random.normal(kx, (B, Cin, H, W), dtype=jnp.float32)
    weight = 0.1 * jax.random.normal(kw, (Cout, Cin), dtype=jnp.float32)
    bias = 0.1 * jax.random.normal(kb, (Cout,), dtype=jnp.float32)

    kp = jax.jit(my_sppe_forward)(x, weight, bias)
    kp = jax.block_until_ready(kp)

    # Pure-JAX reference of the same forward semantics.
    hm_ref = jnp.einsum("oc,bchw->bohw", weight, x) + bias.reshape(1, Cout, 1, 1)
    prob = jax.nn.sigmoid(hm_ref)
    conf = jnp.max(prob.reshape(B, Cout, -1), axis=2, keepdims=True)
    probn = prob / jnp.sum(prob, axis=(2, 3), keepdims=True)
    stride = float(int(256 / H))
    coordx = jnp.arange(W, dtype=jnp.float32)
    coordy = jnp.arange(H, dtype=jnp.float32)
    hmx = jnp.sum(jnp.sum(probn, axis=2) * coordx, axis=2, keepdims=True) * stride
    hmy = jnp.sum(jnp.sum(probn, axis=3) * coordy, axis=2, keepdims=True) * stride
    ref = jnp.concatenate([hmx, hmy, conf], axis=2)

    assert kp.shape == (B, Cout, 3)
    assert bool(jnp.allclose(kp, ref, atol=1e-4, rtol=1e-4))
    print("KERNEL_OK")
</pallas_src>

<mosaic_0001>
module attributes {stable_mosaic.version = 11 : i64} {
  func.func @_sppe_fused_kernel(%arg0: i32, %arg1: memref<2x4x256xf32, #tpu.memory_space<vmem>>, %arg2: memref<8x4xf32, #tpu.memory_space<vmem>>, %arg3: memref<8x1xf32, #tpu.memory_space<vmem>>, %arg4: memref<2x256xf32, #tpu.memory_space<vmem>>, %arg5: memref<2x8x3xf32, #tpu.memory_space<vmem>>) attributes {dimension_semantics = [#tpu.dimension_semantics<arbitrary>], iteration_bounds = array<i64: 1>, scalar_prefetch = 0 : i64, scratch_operands = 0 : i64, tpu.core_type = #tpu.core_type<tc>, window_params = [{transform_indices = @transform_0, window_bounds = array<i64: 2, 4, 256>}, {pipeline_mode = #tpu.pipeline_mode<synchronous>, transform_indices = @transform_1, window_bounds = array<i64: 8, 4>}, {pipeline_mode = #tpu.pipeline_mode<synchronous>, transform_indices = @transform_2, window_bounds = array<i64: 8, 1>}, {pipeline_mode = #tpu.pipeline_mode<synchronous>, transform_indices = @transform_3, window_bounds = array<i64: 2, 256>}, {transform_indices = @transform_4, window_bounds = array<i64: 2, 8, 3>}]} {
    %c0 = arith.constant 0 : index
    %c0_0 = arith.constant 0 : index
    %c0_1 = arith.constant 0 : index
    %0 = vector.load %arg1[%c0, %c0_0, %c0_1] : memref<2x4x256xf32, #tpu.memory_space<vmem>>, vector<2x4x256xf32>
    %c0_2 = arith.constant 0 : index
    %c0_3 = arith.constant 0 : index
    %1 = vector.load %arg2[%c0_2, %c0_3] : memref<8x4xf32, #tpu.memory_space<vmem>>, vector<8x4xf32>
    %c0_4 = arith.constant 0 : index
    %c0_5 = arith.constant 0 : index
    %2 = vector.load %arg3[%c0_4, %c0_5] : memref<8x1xf32, #tpu.memory_space<vmem>>, vector<8x1xf32>
    %3 = vector.shape_cast %2 : vector<8x1xf32> to vector<1x8x1xf32>
    %4 = vector.shape_cast %3 : vector<1x8x1xf32> to vector<1x8x1xf32>
    %5 = vector.broadcast %4 : vector<1x8x1xf32> to vector<2x8x256xf32>
    %6 = vector.extract_strided_slice %1 {offsets = [0, 0], sizes = [8, 1], strides = [1, 1]} : vector<8x4xf32> to vector<8x1xf32>
    %7 = vector.shape_cast %6 : vector<8x1xf32> to vector<1x8x1xf32>
    %8 = vector.extract_strided_slice %0 {offsets = [0, 0, 0], sizes = [2, 1, 256], strides = [1, 1, 1]} : vector<2x4x256xf32> to vector<2x1x256xf32>
    %9 = vector.broadcast %7 : vector<1x8x1xf32> to vector<2x8x256xf32>
    %10 = vector.broadcast %8 : vector<2x1x256xf32> to vector<2x8x256xf32>
    %11 = arith.mulf %9, %10 : vector<2x8x256xf32>
    %12 = arith.addf %5, %11 : vector<2x8x256xf32>
    %13 = vector.extract_strided_slice %1 {offsets = [0, 1], sizes = [8, 1], strides = [1, 1]} : vector<8x4xf32> to vector<8x1xf32>
    %14 = vector.shape_cast %13 : vector<8x1xf32> to vector<1x8x1xf32>
    %15 = vector.extract_strided_slice %0 {offsets = [0, 1, 0], sizes = [2, 1, 256], strides = [1, 1, 1]} : vector<2x4x256xf32> to vector<2x1x256xf32>
    %16 = vector.broadcast %14 : vector<1x8x1xf32> to vector<2x8x256xf32>
    %17 = vector.broadcast %15 : vector<2x1x256xf32> to vector<2x8x256xf32>
    %18 = arith.mulf %16, %17 : vector<2x8x256xf32>
    %19 = arith.addf %12, %18 : vector<2x8x256xf32>
    %20 = vector.extract_strided_slice %1 {offsets = [0, 2], sizes = [8, 1], strides = [1, 1]} : vector<8x4xf32> to vector<8x1xf32>
    %21 = vector.shape_cast %20 : vector<8x1xf32> to vector<1x8x1xf32>
    %22 = vector.extract_strided_slice %0 {offsets = [0, 2, 0], sizes = [2, 1, 256], strides = [1, 1, 1]} : vector<2x4x256xf32> to vector<2x1x256xf32>
    %23 = vector.broadcast %21 : vector<1x8x1xf32> to vector<2x8x256xf32>
    %24 = vector.broadcast %22 : vector<2x1x256xf32> to vector<2x8x256xf32>
    %25 = arith.mulf %23, %24 : vector<2x8x256xf32>
    %26 = arith.addf %19, %25 : vector<2x8x256xf32>
    %27 = vector.extract_strided_slice %1 {offsets = [0, 3], sizes = [8, 1], strides = [1, 1]} : vector<8x4xf32> to vector<8x1xf32>
    %28 = vector.shape_cast %27 : vector<8x1xf32> to vector<1x8x1xf32>
    %29 = vector.extract_strided_slice %0 {offsets = [0, 3, 0], sizes = [2, 1, 256], strides = [1, 1, 1]} : vector<2x4x256xf32> to vector<2x1x256xf32>
    %30 = vector.broadcast %28 : vector<1x8x1xf32> to vector<2x8x256xf32>
    %31 = vector.broadcast %29 : vector<2x1x256xf32> to vector<2x8x256xf32>
    %32 = arith.mulf %30, %31 : vector<2x8x256xf32>
    %33 = arith.addf %26, %32 : vector<2x8x256xf32>
    %34 = arith.negf %33 : vector<2x8x256xf32>
    %35 = math.exp %34 : vector<2x8x256xf32>
    %cst = arith.constant 1.000000e+00 : f32
    %36 = vector.broadcast %cst : f32 to vector<2x8x256xf32>
    %37 = arith.addf %36, %35 : vector<2x8x256xf32>
    %38 = arith.divf %36, %37 : vector<2x8x256xf32>
    %cst_6 = arith.constant dense<0xFF800000> : vector<2x8xf32>
    %39 = vector.multi_reduction <maximumf>, %38, %cst_6 [2] : vector<2x8x256xf32> to vector<2x8xf32>
    %40 = vector.shape_cast %39 : vector<2x8xf32> to vector<2x8x1xf32>
    %cst_7 = arith.constant dense<0.000000e+00> : vector<2x8xf32>
    %41 = vector.multi_reduction <add>, %38, %cst_7 [2] : vector<2x8x256xf32> to vector<2x8xf32>
    %42 = vector.shape_cast %41 : vector<2x8xf32> to vector<2x8x1xf32>
    %c0_8 = arith.constant 0 : index
    %c0_9 = arith.constant 0 : index
    %43 = vector.load %arg4[%c0_8, %c0_9] : memref<2x256xf32, #tpu.memory_space<vmem>>, vector<2x256xf32>
    %44 = vector.extract_strided_slice %43 {offsets = [0, 0], sizes = [1, 256], strides = [1, 1]} : vector<2x256xf32> to vector<1x256xf32>
    %45 = vector.shape_cast %44 : vector<1x256xf32> to vector<1x1x256xf32>
    %46 = vector.extract_strided_slice %43 {offsets = [1, 0], sizes = [1, 256], strides = [1, 1]} : vector<2x256xf32> to vector<1x256xf32>
    %47 = vector.shape_cast %46 : vector<1x256xf32> to vector<1x1x256xf32>
    %cst_10 = arith.constant 1.000000e+00 : f32
    %48 = vector.broadcast %cst_10 : f32 to vector<2x8x1xf32>
    %49 = arith.divf %48, %42 : vector<2x8x1xf32>
    %50 = vector.broadcast %45 : vector<1x1x256xf32> to vector<2x8x256xf32>
    %51 = arith.mulf %38, %50 : vector<2x8x256xf32>
    %cst_11 = arith.constant dense<0.000000e+00> : vector<2x8xf32>
    %52 = vector.multi_reduction <add>, %51, %cst_11 [2] : vector<2x8x256xf32> to vector<2x8xf32>
    %53 = vector.shape_cast %52 : vector<2x8xf32> to vector<2x8x1xf32>
    %54 = arith.mulf %53, %49 : vector<2x8x1xf32>
    %cst_12 = arith.constant 1.600000e+01 : f32
    %55 = vector.broadcast %cst_12 : f32 to vector<2x8x1xf32>
    %56 = arith.mulf %54, %55 : vector<2x8x1xf32>
    %57 = vector.broadcast %47 : vector<1x1x256xf32> to vector<2x8x256xf32>
    %58 = arith.mulf %38, %57 : vector<2x8x256xf32>
    %cst_13 = arith.constant dense<0.000000e+00> : vector<2x8xf32>
    %59 = vector.multi_reduction <add>, %58, %cst_13 [2] : vector<2x8x256xf32> to vector<2x8xf32>
    %60 = vector.shape_cast %59 : vector<2x8xf32> to vector<2x8x1xf32>
    %61 = arith.mulf %60, %49 : vector<2x8x1xf32>
    %cst_14 = arith.constant 1.600000e+01 : f32
    %62 = vector.broadcast %cst_14 : f32 to vector<2x8x1xf32>
    %63 = arith.mulf %61, %62 : vector<2x8x1xf32>
    %64 = tpu.iota {dimensions = array<i32: 2>} : vector<2x8x3xi32>
    %c0_i32 = arith.constant 0 : i32
    %65 = vector.broadcast %c0_i32 : i32 to vector<2x8x3xi32>
    %66 = arith.cmpi eq, %64, %65 : vector<2x8x3xi32>
    %c1_i32 = arith.constant 1 : i32
    %67 = vector.broadcast %c1_i32 : i32 to vector<2x8x3xi32>
    %68 = arith.cmpi eq, %64, %67 : vector<2x8x3xi32>
    %69 = vector.shape_cast %63 : vector<2x8x1xf32> to vector<2x8x1xf32>
    %70 = vector.broadcast %69 : vector<2x8x1xf32> to vector<2x8x3xf32>
    %71 = vector.shape_cast %40 : vector<2x8x1xf32> to vector<2x8x1xf32>
    %72 = vector.broadcast %71 : vector<2x8x1xf32> to vector<2x8x3xf32>
    %73 = arith.select %68, %70, %72 : vector<2x8x3xi1>, vector<2x8x3xf32>
    %74 = vector.shape_cast %56 : vector<2x8x1xf32> to vector<2x8x1xf32>
    %75 = vector.broadcast %74 : vector<2x8x1xf32> to vector<2x8x3xf32>
    %76 = arith.select %66, %75, %73 : vector<2x8x3xi1>, vector<2x8x3xf32>
    %c0_15 = arith.constant 0 : index
    %c0_16 = arith.constant 0 : index
    %c0_17 = arith.constant 0 : index
    %77 = vector.load %arg5[%c0_15, %c0_16, %c0_17] : memref<2x8x3xf32, #tpu.memory_space<vmem>>, vector<2x8x3xf32>
    tpu.vector_store %arg5[%c0_15, %c0_16, %c0_17], %76 {strides = array<i32>} : memref<2x8x3xf32, #tpu.memory_space<vmem>>, vector<2x8x3xf32>,
    return
  }
  func.func @transform_0(%arg0: i32) -> (i32, i32, i32) {
    %c0_i32 = arith.constant 0 : i32
    %c0_i32_0 = arith.constant 0 : i32
    %c0_i32_1 = arith.constant 0 : i32
    return %arg0, %c0_i32, %c0_i32_0 : i32, i32, i32
  }
  func.func @transform_1(%arg0: i32) -> (i32, i32) {
    %c0_i32 = arith.constant 0 : i32
    %c0_i32_0 = arith.constant 0 : i32
    %c0_i32_1 = arith.constant 0 : i32
    return %c0_i32, %c0_i32_0 : i32, i32
  }
  func.func @transform_2(%arg0: i32) -> (i32, i32) {
    %c0_i32 = arith.constant 0 : i32
    %c0_i32_0 = arith.constant 0 : i32
    %c0_i32_1 = arith.constant 0 : i32
    return %c0_i32, %c0_i32_0 : i32, i32
  }
  func.func @transform_3(%arg0: i32) -> (i32, i32) {
    %c0_i32 = arith.constant 0 : i32
    %c0_i32_0 = arith.constant 0 : i32
    %c0_i32_1 = arith.constant 0 : i32
    return %c0_i32, %c0_i32_0 : i32, i32
  }
  func.func @transform_4(%arg0: i32) -> (i32, i32, i32) {
    %c0_i32 = arith.constant 0 : i32
    %c0_i32_0 = arith.constant 0 : i32
    %c0_i32_1 = arith.constant 0 : i32
    return %arg0, %c0_i32, %c0_i32_0 : i32, i32, i32
  }
}

</mosaic_0001>

<bundles_post_ra>
// kernel: my_sppe_forward.1
= control target key start
LH: loop header
LB: loop body
LE: loop exit
PB: predicated region body
PF: predicated region fallthrough
CT: control target
= control target key end

     0   :  { %v374_v0 = vmov 0   ;;  %v375_v1 = vmov 1   ;;  %v376_v4 = vmov 2   ;;  %v377_v5 = vmov 3   ;;  %s468_s1 = inlined_call_operand.vmem [shape: f32[8,4], index: 1, kind: input, shape index: {}]   ;;  %s469_s2 = inlined_call_operand.vmem [shape: f32[8,1], index: 2, kind: input, shape index: {}]   ;;  %s470_s0 = inlined_call_operand.vmem [shape: f32[2,4,256], index: 0, kind: input, shape index: {}]   ;;  %s471_s3 = inlined_call_operand.vmem [shape: f32[2,256], index: 3, kind: input, shape index: {}]   ;;  %s472_s4 = inlined_call_operand.vmem [shape: f32[2,8,3], index: 4, kind: output, shape index: {}]  }
   0x1   :  { %350 = vset.pattern.permute.xlu0 %v374_v0  ;;  %351 = vset.pattern.permute.xlu1 %v375_v1  ;;  %v19_v2 = vld [vmem:[%s468_s1] sm:$0xff]  ;;  %v33_v6 = vlaneseq  ;;  %v18_v11 = vld [vmem:[%s470_s0 + $0x8] sm:$0xff]  ;;  %vm335_vm2 = vcmask 23552  }
   0x2   :  { %28 = vperm.xlu0 %350, %v19_v2   ;;  %78 = vperm.xlu1 %351, %v19_v2   ;;  %v20_v3 = vld [vmem:[%s469_s2] sm:$0xff] }
   0x3   :  { %v34_v7 = vshrl.u32 %v33_v6, 7  ;;  %v17_v10 = vld [vmem:[%s470_s0] sm:$0xff] }
   0x5   :  { %v410_v8 = vsub.s32 0, %v34_v7  ;;  %v39_v9 = vsub.s32 4, %v34_v7  ;;  %v418_v12 = vsub.s32 1, %v34_v7  ;;  %v87_v13 = vsub.s32 5, %v34_v7 }
   0x6   :  { %23 = vperm.xlu0 %350, %v20_v3   ;;  %352 = vset.pattern.permute.xlu1 %v376_v4  ;;  %v420_v14 = vsub.s32 2, %v34_v7  ;;  %v135_v15 = vsub.s32 6, %v34_v7  ;;  %v422_v16 = vsub.s32 3, %v34_v7  ;;  %v183_v17 = vsub.s32 7, %v34_v7 }
   0x7   :  { %126 = vperm.xlu1 %352, %v19_v2   ;;  %v36_v18 = vrot.slane %v17_v10, %v410_v8  ;;  %v40_v19 = vrot.slane %v17_v10, %v39_v9  ;;  %v44_v20 = vrot.slane %v18_v11, %v410_v8  ;;  %v48_v21 = vrot.slane %v18_v11, %v39_v9 }
   0x8   :  { %v84_v22 = vrot.slane %v17_v10, %v418_v12  ;;  %v88_v23 = vrot.slane %v17_v10, %v87_v13  ;;  %v92_v24 = vrot.slane %v18_v11, %v418_v12  ;;  %v96_v25 = vrot.slane %v18_v11, %v87_v13 }
   0x9   :  { %v132_v26 = vrot.slane %v17_v10, %v420_v14  ;;  %v136_v27 = vrot.slane %v17_v10, %v135_v15  ;;  %v140_v28 = vrot.slane %v18_v11, %v420_v14  ;;  %v144_v29 = vrot.slane %v18_v11, %v135_v15 }
   0xa   :  { %353 = vset.pattern.permute.xlu0 %v377_v5  ;;  %v180_v30 = vrot.slane %v17_v10, %v422_v16  ;;  %v184_v31 = vrot.slane %v17_v10, %v183_v17  ;;  %v188_v32 = vrot.slane %v18_v11, %v422_v16  ;;  %v192_v33 = vrot.slane %v18_v11, %v183_v17 }
   0xb   :  { %174 = vperm.xlu0 %353, %v19_v2   ;;  %v56_v34 = vrot.slane %v36_v18, %v410_v8  ;;  %v60_v35 = vrot.slane %v40_v19, %v410_v8  ;;  %v64_v36 = vrot.slane %v44_v20, %v410_v8  ;;  %v68_v37 = vrot.slane %v48_v21, %v410_v8 }
   0xc   :  { %v104_v40 = vrot.slane %v84_v22, %v418_v12  ;;  %v108_v41 = vrot.slane %v88_v23, %v418_v12  ;;  %v112_v42 = vrot.slane %v92_v24, %v418_v12  ;;  %v116_v43 = vrot.slane %v96_v25, %v418_v12 }
   0xd   :  { %v152_v44 = vrot.slane %v132_v26, %v420_v14  ;;  %v156_v45 = vrot.slane %v136_v27, %v420_v14  ;;  %v160_v46 = vrot.slane %v140_v28, %v420_v14  ;;  %v164_v47 = vrot.slane %v144_v29, %v420_v14 }
   0xe   :  { %v200_v48 = vrot.slane %v180_v30, %v422_v16  ;;  %v204_v49 = vrot.slane %v184_v31, %v422_v16  ;;  %v208_v50 = vrot.slane %v188_v32, %v422_v16  ;;  %v212_v51 = vrot.slane %v192_v33, %v422_v16 }
  0x81   :  { %v29_v38 = vpop.permute.xlu0 %28  ;;  %v79_v39 = vpop.permute.xlu1 %78 }
  0x82   :  { %v69_v52 = vmul.f32 %v56_v34, %v29_v38  ;;  %v70_v53 = vmul.f32 %v60_v35, %v29_v38  ;;  %v71_v54 = vmul.f32 %v64_v36, %v29_v38  ;;  %v72_v55 = vmul.f32 %v68_v37, %v29_v38 }
  0x83   :  { %v117_v56 = vmul.f32 %v104_v40, %v79_v39  ;;  %v118_v57 = vmul.f32 %v108_v41, %v79_v39  ;;  %v119_v58 = vmul.f32 %v112_v42, %v79_v39  ;;  %v120_v59 = vmul.f32 %v116_v43, %v79_v39  ;;  %v257_v40 = vld [vmem:[%s471_s3] sm:$0xf] }
  0x84   :  { %v298_v41 = vrot.slane %v257_v40, %v418_v12  ;;  %v302_v42 = vrot.slane %v257_v40, %v422_v16  ;;  %v266_v43 = vrot.slane %v257_v40, %v410_v8 }
  0x85   :  { %v24_v60 = vpop.permute.xlu0 %23 }
  0x86   :  { %v73_v61 = vadd.f32 %v69_v52, %v24_v60  ;;  %v74_v62 = vadd.f32 %v70_v53, %v24_v60  ;;  %v75_v63 = vadd.f32 %v71_v54, %v24_v60  ;;  %v76_v0 = vadd.f32 %v72_v55, %v24_v60  ;;  %v127_v1 = vpop.permute.xlu1 %126 }
  0x87   :  { %v165_v2 = vmul.f32 %v152_v44, %v127_v1  ;;  %v166_v3 = vmul.f32 %v156_v45, %v127_v1  ;;  %v167_v4 = vmul.f32 %v160_v46, %v127_v1  ;;  %v168_v5 = vmul.f32 %v164_v47, %v127_v1 }
  0x88   :  { %v121_v7 = vadd.f32 %v117_v56, %v73_v61  ;;  %v122_v9 = vadd.f32 %v118_v57, %v74_v62  ;;  %v123_v10 = vadd.f32 %v119_v58, %v75_v63  ;;  %v124_v11 = vadd.f32 %v120_v59, %v76_v0 }
  0x89   :  { %v308_v44 = vrot.slane %v298_v41, %v418_v12  ;;  %v312_v45 = vrot.slane %v302_v42, %v418_v12  ;;  %v270_v46 = vrot.slane %v257_v40, %v420_v14 }
  0x8a   :  { %v169_v13 = vadd.f32 %v165_v2, %v121_v7  ;;  %v170_v15 = vadd.f32 %v166_v3, %v122_v9  ;;  %v171_v17 = vadd.f32 %v167_v4, %v123_v10  ;;  %v172_v18 = vadd.f32 %v168_v5, %v124_v11  ;;  %v175_v19 = vpop.permute.xlu0 %174 }
  0x8b   :  { %v213_v20 = vmul.f32 %v200_v48, %v175_v19  ;;  %v214_v21 = vmul.f32 %v204_v49, %v175_v19  ;;  %v215_v22 = vmul.f32 %v208_v50, %v175_v19  ;;  %v216_v23 = vmul.f32 %v212_v51, %v175_v19 }
  0x8c   :  { %v276_v49 = vrot.slane %v266_v43, %v410_v8  ;;  %v280_v54 = vrot.slane %v270_v46, %v410_v8  ;;  %v328_v7 = vand.u32 127, %v33_v6 }
  0x8d   :  { %v217_v24 = vadd.f32 %v213_v20, %v169_v13  ;;  %v218_v25 = vadd.f32 %v214_v21, %v170_v15  ;;  %v219_v26 = vadd.f32 %v215_v22, %v171_v17  ;;  %v220_v27 = vadd.f32 %v216_v23, %v172_v18 }
  0x8e   :  { %vm329_vm0 = vcmp.eq.s32.totalorder %v328_v7, 0  ;;  %vm330_vm1 = vcmp.eq.s32.totalorder %v328_v7, 1 }
  0x8f   :  { %v342_v28 = vmul.f32 -1.442695, %v217_v24  ;;  %v343_v29 = vmul.f32 -1.442695, %v218_v25  ;;  %v344_v30 = vmul.f32 -1.442695, %v219_v26 }
  0x90   :  { %v345_v31 = vmul.f32 -1.442695, %v220_v27 }
  0x91   :  { %354 = vpow2.f32 %v342_v28 }
  0x92   :  { %356 = vpow2.f32 %v343_v29 }
  0x93   :  { %358 = vpow2.f32 %v344_v30 }
  0x94   :  { %360 = vpow2.f32 %v345_v31 }
  0x9b   :  { %v355_v32 = vpop.eup %354 }
  0x9c   :  { %v357_v33 = vpop.eup %356  ;;  %v233_v34 = vadd.f32 1.0, %v355_v32 }
  0x9d   :  { %v359_v35 = vpop.eup %358  ;;  %v234_v36 = vadd.f32 1.0, %v357_v33 }
  0x9e   :  { %v361_v37 = vpop.eup %360  ;;  %v235_v38 = vadd.f32 1.0, %v359_v35  ;;  %362 = vrcp.f32 %v233_v34 }
  0x9f   :  { %v236_v39 = vadd.f32 1.0, %v361_v37  ;;  %364 = vrcp.f32 %v234_v36 }
  0xa0   :  { %366 = vrcp.f32 %v235_v38 }
  0xa1   :  { %368 = vrcp.f32 %v236_v39 }
  0xa8   :  { %v363_v47 = vpop.eup %362 }
  0xa9   :  { %v365_v48 = vpop.eup %364  ;;  %v313_v52 = vmul.f32 %v363_v47, %v308_v44  ;;  %v281_v12 = vmul.f32 %v363_v47, %v276_v49 }
  0xaa   :  { %v367_v50 = vpop.eup %366  ;;  %v251_v51 = vadd.f32 %v365_v48, %v363_v47  ;;  %v314_v53 = vmul.f32 %v365_v48, %v312_v45  ;;  %v282_v59 = vmul.f32 %v365_v48, %v280_v54  ;;  %v245_v0 = vmax.f32 %v363_v47, %v365_v48 }
  0xab   :  { %v369_v55 = vpop.eup %368  ;;  %v315_v56 = vmul.f32 %v367_v50, %v308_v44  ;;  %v283_v60 = vmul.f32 %v367_v50, %v276_v49 }
  0xac   :  { %v254_v16 = vadd.f32 %v369_v55, %v367_v50  ;;  %252 = vadd.xlane.f32.xlu1 %v251_v51  ;;  %v316_v57 = vmul.f32 %v369_v55, %v312_v45  ;;  %v317_v58 = vadd.f32 %v314_v53, %v313_v52  ;;  %v284_v61 = vmul.f32 %v369_v55, %v280_v54 }
  0xad   :  { %v285_v62 = vadd.f32 %v282_v59, %v281_v12  ;;  %v248_v8 = vmax.f32 %v367_v50, %v369_v55 }
  0xae   :  { %255 = vadd.xlane.f32.xlu0 %v254_v16  ;;  %v320_v14 = vadd.f32 %v316_v57, %v315_v56  ;;  %v288_v63 = vadd.f32 %v284_v61, %v283_v60 }
  0xb0   :  { %318 = vadd.xlane.f32.xlu1 %v317_v58 }
  0xb2   :  { %321 = vadd.xlane.f32.xlu0 %v320_v14 }
  0xb4   :  { %286 = vadd.xlane.f32.xlu1 %v285_v62 }
  0xb6   :  { %289 = vadd.xlane.f32.xlu0 %v288_v63 }
  0xb8   :  { %246 = vmax.xlane.f32.xlu1 %v245_v0 }
  0xba   :  { %249 = vmax.xlane.f32.xlu0 %v248_v8 }
 0x139   :  { %v253_v1 = vpop.xlane.xlu1 %252 }
 0x13a   :  { %370 = vrcp.f32 %v253_v1 }
 0x13b   :  { %v256_v2 = vpop.xlane.xlu0 %255 }
 0x13c   :  { %372 = vrcp.f32 %v256_v2 }
 0x13d   :  { %v319_v3 = vpop.xlane.xlu1 %318 }
 0x13f   :  { %v322_v4 = vpop.xlane.xlu0 %321 }
 0x141   :  { %v287_v5 = vpop.xlane.xlu1 %286 }
 0x143   :  { %v290_v10 = vpop.xlane.xlu0 %289 }
 0x144   :  { %v371_v9 = vpop.eup %370 }
 0x145   :  { %v323_v11 = vmul.f32 %v371_v9, %v319_v3  ;;  %v291_v13 = vmul.f32 %v371_v9, %v287_v5  ;;  %v247_v21 = vpop.xlane.xlu1 %246 }
 0x146   :  { %v373_v15 = vpop.eup %372 }
 0x147   :  { %v324_v17 = vmul.f32 %v373_v15, %v322_v4  ;;  %v325_v18 = vmul.f32 16.0, %v323_v11  ;;  %v292_v19 = vmul.f32 %v373_v15, %v290_v10  ;;  %v293_v20 = vmul.f32 16.0, %v291_v13  ;;  %v250_v25 = vpop.xlane.xlu0 %249 }
 0x149   :  { %v326_v22 = vmul.f32 16.0, %v324_v17  ;;  %v294_v23 = vmul.f32 16.0, %v292_v19  ;;  %v331_v24 = vsel %vm330_vm1, %v325_v18, %v247_v21 }
 0x14a   :  { %v333_v26 = vsel %vm329_vm0, %v293_v20, %v331_v24 }
 0x14b   :  { %v332_v6 = vsel %vm330_vm1, %v326_v22, %v250_v25  ;;  %336 = vst.msk [vmem:[%s472_s4] sm:$0xff] %vm335_vm2, %v333_v26 }
 0x14c   :  { %v334_v27 = vsel %vm329_vm0, %v294_v23, %v332_v6 }
 0x14d   :  { %337 = vst.msk [vmem:[%s472_s4 + $0x8] sm:$0xff] %vm335_vm2, %v334_v27 }

</bundles_post_ra>
